<compile_context>
chip_gen: v7x
topology: tpu7x:2x2x1
jax: 0.10.0
libtpu: 0.0.40
codegen_flags: <defaults>
</compile_context>

<pallas_src>
import jax
import jax.numpy as jnp
from jax.experimental import pallas as pl
from jax.experimental.pallas import tpu as pltpu


def _identity_kernel(x_ref, o_ref):
    # Straight VMEM copy of the current tile; dtype preserved bit-exactly.
    o_ref[...] = x_ref[...]


def _pick_row_tile(m: int) -> int:
    # Largest sublane-aligned row tile that evenly divides m (bigger tile ->
    # fewer grid steps, closer to the HBM roofline for this mem-bound copy).
    for t in (512, 256, 128, 64, 32, 16, 8):
        if m % t == 0:
            return t
    return m  # full extent (always legal: block dim == array dim)


def identity_forward(x, *args, **kwargs):
    """IdentityMap.forward: return x unchanged (extra args/kwargs ignored)."""
    if x.ndim == 0 or x.size == 0:
        return x  # nothing to tile; identity is trivially x

    orig_shape = x.shape
    n = orig_shape[-1]
    m = 1
    for d in orig_shape[:-1]:
        m *= d
    x2 = x.reshape(m, n)

    tm = _pick_row_tile(m)
    grid = (m // tm,)

    out = pl.pallas_call(
        _identity_kernel,
        out_shape=jax.ShapeDtypeStruct((m, n), x.dtype),
        grid_spec=pltpu.PrefetchScalarGridSpec(
            num_scalar_prefetch=0,
            grid=grid,
            in_specs=[pl.BlockSpec((tm, n), lambda i: (i, 0))],
            out_specs=pl.BlockSpec((tm, n), lambda i: (i, 0)),
        ),
        compiler_params=pltpu.CompilerParams(
            dimension_semantics=("parallel",),
        ),
    )(x2)
    return out.reshape(orig_shape)


if __name__ == "__main__":
    # Small shapes consistent with the module's use in llava: x is a stack of
    # vision-token features (batch, seq, hidden).
    B, L, E = 2, 8, 32
    key = jax.random.PRNGKey(0)
    x = jax.random.normal(key, (B, L, E), dtype=jnp.float32)

    out = identity_forward(x)
    out = jax.block_until_ready(out)

    assert out.shape == x.shape, out.shape
    assert out.dtype == x.dtype, out.dtype
    assert jnp.array_equal(out, x), float(jnp.max(jnp.abs(out - x)))

    # Signature parity with forward(x, *args, **kwargs) + a bf16 dtype check.
    xb = x.astype(jnp.bfloat16)
    outb = jax.block_until_ready(identity_forward(xb, None, unused_kwarg=1))
    assert outb.dtype == jnp.bfloat16
    assert jnp.array_equal(outb, xb)

    print("KERNEL_OK")
</pallas_src>

<mosaic_0001>
module attributes {stable_mosaic.version = 11 : i64} {
  func.func @_identity_kernel(%arg0: i32, %arg1: memref<16x32xf32, #tpu.memory_space<vmem>>, %arg2: memref<16x32xf32, #tpu.memory_space<vmem>>) attributes {dimension_semantics = [#tpu.dimension_semantics<parallel>], iteration_bounds = array<i64: 1>, scalar_prefetch = 0 : i64, scratch_operands = 0 : i64, tpu.core_type = #tpu.core_type<tc>, window_params = [{transform_indices = @transform_0, window_bounds = array<i64: 16, 32>}, {transform_indices = @transform_1, window_bounds = array<i64: 16, 32>}]} {
    %c0 = arith.constant 0 : index
    %c0_0 = arith.constant 0 : index
    %0 = vector.load %arg1[%c0, %c0_0] : memref<16x32xf32, #tpu.memory_space<vmem>>, vector<16x32xf32>
    %c0_1 = arith.constant 0 : index
    %c0_2 = arith.constant 0 : index
    %1 = vector.load %arg2[%c0_1, %c0_2] : memref<16x32xf32, #tpu.memory_space<vmem>>, vector<16x32xf32>
    tpu.vector_store %arg2[%c0_1, %c0_2], %0 {strides = array<i32>} : memref<16x32xf32, #tpu.memory_space<vmem>>, vector<16x32xf32>,
    return
  }
  func.func @transform_0(%arg0: i32) -> (i32, i32) {
    %c0_i32 = arith.constant 0 : i32
    %c0_i32_0 = arith.constant 0 : i32
    return %arg0, %c0_i32 : i32, i32
  }
  func.func @transform_1(%arg0: i32) -> (i32, i32) {
    %c0_i32 = arith.constant 0 : i32
    %c0_i32_0 = arith.constant 0 : i32
    return %arg0, %c0_i32 : i32, i32
  }
}

</mosaic_0001>

<bundles_post_ra>
// kernel: tpu_custom_call.1
= control target key start
LH: loop header
LB: loop body
LE: loop exit
PB: predicated region body
PF: predicated region fallthrough
CT: control target
= control target key end

     0   :  { %6 = vsyncpa [#allocation3], 0  ;;  %s135_s0 = inlined_call_operand.hbm [shape: f32[16,32], index: 0, kind: input, shape index: {}]   ;;  %s136_s1 = inlined_call_operand.hbm [shape: f32[16,32], index: 1, kind: output, shape index: {}]  }
   0x1   :  { %7 = vsyncpa [#allocation4], 0  ;;  %s97_s6 = smov [#allocation2]   ;;  %s49_s10 = scalar_lea.hbm %s135_s0, 256 }
   0x2   :  { %s13_s7 = sshll.u32 %s97_s6, 4  ;;  %p50_p0 = scmp.ne.s32.totalorder %s135_s0, %s49_s10  ;;  %s14_s7 = int_to_ptr.vmem [resolvable:$true] %s13_s7 }
   0x3   :  { %p53_p1 = scmp.lt.u32.totalorder %s49_s10, %s135_s0 }
   0x5   :  { %p55_p2 = pnand %p53_p1, %p50_p0 }
   0x7   :  { %58 = shalt.err (!%p55_p2)
}
   0x8   :  { %s59_s15 = scalar_lea.vmem %s14_s7, 256  ;;  %p64_p4 = scmp.lt.s32.totalorder %s14_s7, %s14_s7 }
   0x9   :  { %p60_p3 = scmp.ne.s32.totalorder %s14_s7, %s59_s15  ;;  %p65_p5 = scmp.lt.s32.totalorder %s59_s15, %s59_s15 }
   0xb   :  { %p66_p6 = por %p65_p5, %p64_p4 }
   0xd   :  { %p67_p7 = pnand %p66_p6, %p60_p3 }
   0xf   :  { %70 = shalt.err (!%p67_p7)
}
  0x10   :  { %s98_s16 = smov 128   ;;  %s99_s17 = smov 8  }
  0x11   :  { %19 = dma.hbm_to_vmem [thread:$0]  %s135_s0, 256, %s14_s7, [#allocation3], %s98_s16, %s98_s16, %s99_s17  }
  0x12   :  { %93 = dma.done.wait [#allocation3], 256  }
  0x13   :  { %94 = vsyncadd [#allocation3], 4294967040  ;;  %s100_s20 = smov [#allocation5]   ;;  %vm25_vm0 = vcmask 261120   ;;  %v23_v0 = vld [vmem:[#allocation2] sm:$0xff]  ;;  %v24_v1 = vld [vmem:[#allocation2 + $0x8] sm:$0xff] }
  0x14   :  { %s33_s21 = sshll.u32 %s100_s20, 4  ;;  %26 = vst.msk [vmem:[#allocation5] sm:$0xff] %vm25_vm0, %v23_v0  ;;  %27 = vst.msk [vmem:[#allocation5 + $0x8] sm:$0xff] %vm25_vm0, %v24_v1  ;;  %s34_s21 = int_to_ptr.vmem [resolvable:$true] %s33_s21 }
  0x15   :  { %s71_s22 = scalar_lea.vmem %s34_s21, 256  ;;  %p76_p9 = scmp.lt.s32.totalorder %s34_s21, %s34_s21 }
  0x16   :  { %p72_p8 = scmp.ne.s32.totalorder %s34_s21, %s71_s22  ;;  %p77_p10 = scmp.lt.s32.totalorder %s71_s22, %s71_s22 }
  0x18   :  { %p78_p11 = por %p77_p10, %p76_p9 }
  0x1a   :  { %p79_p12 = pnand %p78_p11, %p72_p8 }
  0x1c   :  { %82 = shalt.err (!%p79_p12)
}
  0x1d   :  { %s83_s0 = scalar_lea.hbm %s136_s1, 256 }
  0x1e   :  { %p84_p13 = scmp.ne.s32.totalorder %s136_s1, %s83_s0  ;;  %p87_p0 = scmp.lt.u32.totalorder %s83_s0, %s136_s1 }
  0x20   :  { %p89_p1 = pnand %p87_p0, %p84_p13 }
  0x22   :  { %92 = shalt.err (!%p89_p1)
}
  0x23   :  { %39 = dma.vmem_to_hbm [thread:$0]  %s34_s21, 256, %s136_s1, [#allocation4], %s98_s16, %s98_s16, %s99_s17  }
  0x24   :  { %95 = dma.done.wait [#allocation4], 256  }
  0x25   :  { %96 = vsyncadd [#allocation4], 4294967040 }
  0x26   :  { %43 = vsyncpa [#allocation3], 1 }
  0x27   :  { %44 = vsyncpa [#allocation4], 1 }

</bundles_post_ra>
